<compile_context>
chip_gen: v5e
topology: v5e:2x2
jax: 0.10.0
libtpu: 0.0.40
codegen_flags: <defaults>
</compile_context>

<pallas_src>
import functools

import jax
import jax.numpy as jnp
from jax.experimental import pallas as pl
from jax.experimental.pallas import tpu as pltpu


# ---------------------------------------------------------------------------
# Kernel (channel-major: C in sublanes, spatial axis in the 128-wide lanes)
# ---------------------------------------------------------------------------
def _cgb_kernel(
    x_ref, y_ref,                                   # (Cf, T), (Cy, T)
    wpx_ref, wpy_ref,                               # (C, Cf), (C, Cy)
    w1x_ref, w2x_ref, w1y_ref, w2y_ref,             # (C, C) gating MLPs (LN folded into w1*)
    woy_ref, wox_ref,                               # (C, C) output projections
    bvec_ref,                                       # (C, 8) packed bias columns
    xo_ref, yo_ref,                                 # (C, T), (C, T)
):
    f32 = jnp.float32
    x = x_ref[...].astype(f32)
    y = y_ref[...].astype(f32)

    bv = bvec_ref[...]
    b_px, b_py = bv[:, 0:1], bv[:, 1:2]
    b1x, b2x = bv[:, 2:3], bv[:, 3:4]
    b1y, b2y = bv[:, 4:5], bv[:, 5:6]
    b_oy, b_ox = bv[:, 6:7], bv[:, 7:8]

    # 1x1 convolutions == channel-mixing matmuls; the large spatial axis
    # streams through the MXU N dimension.
    x0 = jnp.dot(wpx_ref[...], x, preferred_element_type=f32) + b_px
    y0 = jnp.dot(wpy_ref[...], y, preferred_element_type=f32) + b_py

    def ln(t, eps=1e-5):
        # gamma/beta are folded into w1*/b1* at pack time.
        mu = jnp.mean(t, axis=0, keepdims=True)               # sublane reduce (XLU)
        var = jnp.mean((t - mu) * (t - mu), axis=0, keepdims=True)
        return (t - mu) * jax.lax.rsqrt(var + eps)

    gx = jnp.dot(
        w2x_ref[...],
        jax.nn.gelu(jnp.dot(w1x_ref[...], ln(x0), preferred_element_type=f32) + b1x,
                    approximate=True),
        preferred_element_type=f32) + b2x
    gy = jnp.dot(
        w2y_ref[...],
        jax.nn.gelu(jnp.dot(w1y_ref[...], ln(y0), preferred_element_type=f32) + b1y,
                    approximate=True),
        preferred_element_type=f32) + b2y

    # Cross gating + output projections + residuals.
    y_out = jnp.dot(woy_ref[...], y0 * gx, preferred_element_type=f32) + b_oy + y0
    x_out = jnp.dot(wox_ref[...], x0 * gy, preferred_element_type=f32) + b_ox + y_out + x0

    xo_ref[...] = x_out.astype(xo_ref.dtype)
    yo_ref[...] = y_out.astype(yo_ref.dtype)


# ---------------------------------------------------------------------------
# Parameter packing (host-side, once): transpose weights to (Cout, Cin), fold
# LN gamma/beta into the first gating dense, pack the 8 bias vectors.
# ---------------------------------------------------------------------------
def pack_cgb_params(params):
    f32 = jnp.float32

    def t(name):
        return jnp.asarray(params[name], f32).T

    def col(name):
        return jnp.asarray(params[name], f32).reshape(-1, 1)

    # LN fold:  W1t @ (s*gamma + beta) = (W1t * gamma_row) @ s + W1t @ beta
    w1x_t = t("w1x") * jnp.asarray(params["lnx_g"], f32).reshape(1, -1)
    w1y_t = t("w1y") * jnp.asarray(params["lny_g"], f32).reshape(1, -1)
    b1x = col("b1x") + t("w1x") @ col("lnx_b")
    b1y = col("b1y") + t("w1y") @ col("lny_b")

    return {
        "wpx_t": t("w_px"),                      # (C, Cf)
        "wpy_t": t("w_py"),                      # (C, Cy)
        "w1x_t": w1x_t, "w2x_t": t("w2x"),       # (C, C)
        "w1y_t": w1y_t, "w2y_t": t("w2y"),       # (C, C)
        "woy_t": t("w_oy"), "wox_t": t("w_ox"),  # (C, C)
        "bvecs": jnp.concatenate(
            [col("b_px"), col("b_py"), b1x, col("b2x"),
             b1y, col("b2y"), col("b_oy"), col("b_ox")], axis=1),   # (C, 8)
    }


# ---------------------------------------------------------------------------
# Tiling helpers
# ---------------------------------------------------------------------------
def _choose_tile_and_pad(hw: int, batch: int, max_tile: int):
    """Pick a 128-multiple lane tile and padded spatial extent.

    Minimizes (grid steps, padded bytes, -tile); then guarantees >= 2 grid
    programs when possible so both v7x TensorCores get work.
    """
    max_tile = max(128, (max_tile // 128) * 128)
    best = None
    t = 128
    while t <= max_tile:
        pad = ((hw + t - 1) // t) * t
        key = (pad // t, pad, -t)
        if best is None or key < best:
            best = key
        t += 128
    tile = -best[2]
    pad = best[1]
    while batch * (pad // tile) < 2 and tile > 128:
        tile = max(128, ((tile // 2) // 128) * 128)
        pad = ((hw + tile - 1) // tile) * tile
    return tile, pad


@functools.lru_cache(maxsize=1)
def _vmem_limit_bytes() -> int:
    """32 MiB on 64-MiB-VMEM chips (v7x-class), 64 MiB on 128-MiB chips."""
    try:
        cap = int(getattr(pltpu.get_tpu_info(), "vmem_capacity_bytes"))
        return 32 * 1024 * 1024 if cap <= 64 * 1024 * 1024 else 64 * 1024 * 1024
    except Exception:
        return 32 * 1024 * 1024


# ---------------------------------------------------------------------------
# Wrapper
# ---------------------------------------------------------------------------
@functools.partial(jax.jit, static_argnames=("max_tile_hw", "io_dtype"))
def cgb_forward(x_nchw, y_nchw, packed, *, max_tile_hw=1024, io_dtype=jnp.bfloat16):
    """x: (B, Cf, H, W), y: (B, Cy, H, W) NCHW -> (x_out, y_out), both (B, C, H, W).

    Activations cross HBM in `io_dtype` (bf16 default); compute is f32.
    """
    B, Cf, H, W = x_nchw.shape
    By, Cy, Hy, Wy = y_nchw.shape
    assert (B, H, W) == (By, Hy, Wy)
    HW = H * W
    C = packed["wpx_t"].shape[0]
    assert packed["wpx_t"].shape[1] == Cf, "x channel count must match w_px"
    assert packed["wpy_t"].shape[1] == Cy, "y channel count must match w_py"

    tile, hw_pad = _choose_tile_and_pad(HW, B, max_tile_hw)

    # Pure reshape + cheap lane pad; bf16 at the HBM boundary halves DMA bytes.
    x3d = x_nchw.reshape(B, Cf, HW).astype(io_dtype)
    y3d = y_nchw.reshape(B, Cy, HW).astype(io_dtype)
    if hw_pad != HW:
        padw = ((0, 0), (0, 0), (0, hw_pad - HW))
        x3d = jnp.pad(x3d, padw)
        y3d = jnp.pad(y3d, padw)

    grid = (B, hw_pad // tile)

    def io_spec(ch):
        return pl.BlockSpec((None, ch, tile), lambda b, t: (b, 0, t))

    def full_spec(arr):
        # Constant index map -> parameter stays resident in VMEM (one DMA).
        return pl.BlockSpec(arr.shape, lambda b, t: (0, 0))

    w_args = (packed["wpx_t"], packed["wpy_t"],
              packed["w1x_t"], packed["w2x_t"],
              packed["w1y_t"], packed["w2y_t"],
              packed["woy_t"], packed["wox_t"],
              packed["bvecs"])

    n_tok = B * hw_pad
    itemsize = jnp.dtype(io_dtype).itemsize
    cost = pl.CostEstimate(
        flops=2 * n_tok * (Cf * C + Cy * C + 6 * C * C) + 24 * n_tok * C,
        transcendentals=2 * n_tok * C,
        bytes_accessed=itemsize * n_tok * (Cf + Cy + 2 * C)
        + 4 * sum(int(a.size) for a in w_args),
    )

    x_out3d, y_out3d = pl.pallas_call(
        _cgb_kernel,
        out_shape=(
            jax.ShapeDtypeStruct((B, C, hw_pad), io_dtype),
            jax.ShapeDtypeStruct((B, C, hw_pad), io_dtype),
        ),
        grid_spec=pltpu.PrefetchScalarGridSpec(
            num_scalar_prefetch=0,
            grid=grid,
            in_specs=[io_spec(Cf), io_spec(Cy)] + [full_spec(a) for a in w_args],
            out_specs=[io_spec(C), io_spec(C)],
        ),
        compiler_params=pltpu.CompilerParams(
            dimension_semantics=("parallel", "parallel"),
            vmem_limit_bytes=_vmem_limit_bytes(),
        ),
        cost_estimate=cost,
    )(x3d, y3d, *w_args)

    if hw_pad != HW:
        x_out3d = x_out3d[:, :, :HW]
        y_out3d = y_out3d[:, :, :HW]
    return x_out3d.reshape(B, C, H, W), y_out3d.reshape(B, C, H, W)


# ---------------------------------------------------------------------------
# Deterministic parameter init (synthetic; shapes implied by the module)
# ---------------------------------------------------------------------------
def init_cgb_params(key, first_num_channels, num_channels, same=True):
    Cf, C = first_num_channels, num_channels
    Cy_in = C if same else Cf  # `same` controls y's input channel count
    ks = jax.random.split(key, 10)

    def dense(k, din, dout):
        kw, kb = jax.random.split(k)
        w = jax.random.normal(kw, (din, dout), jnp.float32) / jnp.sqrt(float(din))
        b = 0.01 * jax.random.normal(kb, (1, dout), jnp.float32)
        return w, b

    p = {}
    p["w_px"], p["b_px"] = dense(ks[0], Cf, C)
    p["w_py"], p["b_py"] = dense(ks[1], Cy_in, C)
    p["lnx_g"] = jnp.ones((1, C), jnp.float32)
    p["lnx_b"] = jnp.zeros((1, C), jnp.float32)
    p["lny_g"] = jnp.ones((1, C), jnp.float32)
    p["lny_b"] = jnp.zeros((1, C), jnp.float32)
    p["w1x"], p["b1x"] = dense(ks[2], C, C)
    p["w2x"], p["b2x"] = dense(ks[3], C, C)
    p["w1y"], p["b1y"] = dense(ks[4], C, C)
    p["w2y"], p["b2y"] = dense(ks[5], C, C)
    p["w_oy"], p["b_oy"] = dense(ks[6], C, C)
    p["w_ox"], p["b_ox"] = dense(ks[7], C, C)
    return p


# ---------------------------------------------------------------------------
# Pure-JAX reference (token-major, un-folded params) for validation
# ---------------------------------------------------------------------------
def cgb_reference(x_nchw, y_nchw, params):
    hi = jax.lax.Precision.HIGHEST
    B, Cf, H, W = x_nchw.shape
    Cy = y_nchw.shape[1]
    C = params["w_px"].shape[1]
    x = jnp.transpose(x_nchw, (0, 2, 3, 1)).reshape(-1, Cf)
    y = jnp.transpose(y_nchw, (0, 2, 3, 1)).reshape(-1, Cy)
    x0 = jnp.dot(x, params["w_px"], precision=hi) + params["b_px"]
    y0 = jnp.dot(y, params["w_py"], precision=hi) + params["b_py"]

    def ln(t, g, b, eps=1e-5):
        mu = jnp.mean(t, axis=-1, keepdims=True)
        var = jnp.mean((t - mu) ** 2, axis=-1, keepdims=True)
        return (t - mu) * jax.lax.rsqrt(var + eps) * g + b

    xs = ln(x0, params["lnx_g"], params["lnx_b"])
    ys = ln(y0, params["lny_g"], params["lny_b"])
    gx = jnp.dot(jax.nn.gelu(jnp.dot(xs, params["w1x"], precision=hi) + params["b1x"],
                             approximate=True), params["w2x"], precision=hi) + params["b2x"]
    gy = jnp.dot(jax.nn.gelu(jnp.dot(ys, params["w1y"], precision=hi) + params["b1y"],
                             approximate=True), params["w2y"], precision=hi) + params["b2y"]
    y_out = jnp.dot(y0 * gx, params["w_oy"], precision=hi) + params["b_oy"] + y0
    x_out = jnp.dot(x0 * gy, params["w_ox"], precision=hi) + params["b_ox"] + y_out + x0
    x_out = jnp.transpose(x_out.reshape(B, H, W, C), (0, 3, 1, 2))
    y_out = jnp.transpose(y_out.reshape(B, H, W, C), (0, 3, 1, 2))
    return x_out, y_out


if __name__ == "__main__":
    B, Cf, C, H, W = 2, 4, 8, 16, 16
    grid_size, drop_path, same = 4, 0.0, True  # drop_path: identity at inference

    key = jax.random.PRNGKey(0)
    kx, ky, kp = jax.random.split(key, 3)
    x = jax.random.normal(kx, (B, Cf, H, W), jnp.float32)  # NCHW, like PyTorch
    y = jax.random.normal(ky, (B, C, H, W), jnp.float32)

    params = init_cgb_params(kp, Cf, C, same=same)
    packed = pack_cgb_params(params)
    x_ref, y_ref = cgb_reference(x, y, params)

    # 1) f32 I/O: tight check of the kernel math (incl. LN folding).
    x_out, y_out = cgb_forward(x, y, packed, io_dtype=jnp.float32)
    jax.block_until_ready((x_out, y_out))
    assert x_out.shape == (B, C, H, W) and y_out.shape == (B, C, H, W)
    assert bool(jnp.allclose(x_out, x_ref, rtol=1e-2, atol=1e-2))
    assert bool(jnp.allclose(y_out, y_ref, rtol=1e-2, atol=1e-2))

    # 2) Default bf16 HBM boundary (halves DMA bytes): looser tolerance.
    x_b, y_b = cgb_forward(x, y, packed)
    jax.block_until_ready((x_b, y_b))
    assert bool(jnp.allclose(x_b.astype(jnp.float32), x_ref, rtol=5e-2, atol=1e-1))
    assert bool(jnp.allclose(y_b.astype(jnp.float32), y_ref, rtol=5e-2, atol=1e-1))

    # 3) Non-128-multiple spatial extent: exercises the lane-padding path.
    H2, W2 = 10, 12  # HW = 120 -> padded to 128 lanes
    x2 = jax.random.normal(kx, (B, Cf, H2, W2), jnp.float32)
    y2 = jax.random.normal(ky, (B, C, H2, W2), jnp.float32)
    x2_ref, y2_ref = cgb_reference(x2, y2, params)
    x2_out, y2_out = cgb_forward(x2, y2, packed, io_dtype=jnp.float32)
    jax.block_until_ready((x2_out, y2_out))
    assert x2_out.shape == (B, C, H2, W2) and y2_out.shape == (B, C, H2, W2)
    assert bool(jnp.allclose(x2_out, x2_ref, rtol=1e-2, atol=1e-2))
    assert bool(jnp.allclose(y2_out, y2_ref, rtol=1e-2, atol=1e-2))

    print("KERNEL_OK")
</pallas_src>

<mosaic_0001>
module attributes {stable_mosaic.version = 11 : i64} {
  func.func @_cgb_kernel(%arg0: i32, %arg1: i32, %arg2: memref<1x4x256xf32, #tpu.memory_space<vmem>>, %arg3: memref<1x8x256xf32, #tpu.memory_space<vmem>>, %arg4: memref<8x4xf32, #tpu.memory_space<vmem>>, %arg5: memref<8x8xf32, #tpu.memory_space<vmem>>, %arg6: memref<8x8xf32, #tpu.memory_space<vmem>>, %arg7: memref<8x8xf32, #tpu.memory_space<vmem>>, %arg8: memref<8x8xf32, #tpu.memory_space<vmem>>, %arg9: memref<8x8xf32, #tpu.memory_space<vmem>>, %arg10: memref<8x8xf32, #tpu.memory_space<vmem>>, %arg11: memref<8x8xf32, #tpu.memory_space<vmem>>, %arg12: memref<8x8xf32, #tpu.memory_space<vmem>>, %arg13: memref<1x8x256xf32, #tpu.memory_space<vmem>>, %arg14: memref<1x8x256xf32, #tpu.memory_space<vmem>>) attributes {dimension_semantics = [#tpu.dimension_semantics<parallel>, #tpu.dimension_semantics<parallel>], iteration_bounds = array<i64: 2, 1>, scalar_prefetch = 0 : i64, scratch_operands = 0 : i64, tpu.core_type = #tpu.core_type<tc>, window_params = [{transform_indices = @transform_0, window_bounds = array<i64: 1, 4, 256>}, {transform_indices = @transform_1, window_bounds = array<i64: 1, 8, 256>}, {pipeline_mode = #tpu.pipeline_mode<synchronous>, transform_indices = @transform_2, window_bounds = array<i64: 8, 4>}, {pipeline_mode = #tpu.pipeline_mode<synchronous>, transform_indices = @transform_3, window_bounds = array<i64: 8, 8>}, {pipeline_mode = #tpu.pipeline_mode<synchronous>, transform_indices = @transform_4, window_bounds = array<i64: 8, 8>}, {pipeline_mode = #tpu.pipeline_mode<synchronous>, transform_indices = @transform_5, window_bounds = array<i64: 8, 8>}, {pipeline_mode = #tpu.pipeline_mode<synchronous>, transform_indices = @transform_6, window_bounds = array<i64: 8, 8>}, {pipeline_mode = #tpu.pipeline_mode<synchronous>, transform_indices = @transform_7, window_bounds = array<i64: 8, 8>}, {pipeline_mode = #tpu.pipeline_mode<synchronous>, transform_indices = @transform_8, window_bounds = array<i64: 8, 8>}, {pipeline_mode = #tpu.pipeline_mode<synchronous>, transform_indices = @transform_9, window_bounds = array<i64: 8, 8>}, {pipeline_mode = #tpu.pipeline_mode<synchronous>, transform_indices = @transform_10, window_bounds = array<i64: 8, 8>}, {transform_indices = @transform_11, window_bounds = array<i64: 1, 8, 256>}, {transform_indices = @transform_12, window_bounds = array<i64: 1, 8, 256>}]} {
    %c0 = arith.constant 0 : index
    %c0_0 = arith.constant 0 : index
    %c0_1 = arith.constant 0 : index
    %0 = vector.load %arg2[%c0, %c0_0, %c0_1] : memref<1x4x256xf32, #tpu.memory_space<vmem>>, vector<1x4x256xf32>
    %1 = vector.shape_cast %0 : vector<1x4x256xf32> to vector<4x256xf32>
    %c0_2 = arith.constant 0 : index
    %c0_3 = arith.constant 0 : index
    %c0_4 = arith.constant 0 : index
    %2 = vector.load %arg3[%c0_2, %c0_3, %c0_4] : memref<1x8x256xf32, #tpu.memory_space<vmem>>, vector<1x8x256xf32>
    %3 = vector.shape_cast %2 : vector<1x8x256xf32> to vector<8x256xf32>
    %c0_5 = arith.constant 0 : index
    %c0_6 = arith.constant 0 : index
    %4 = vector.load %arg12[%c0_5, %c0_6] : memref<8x8xf32, #tpu.memory_space<vmem>>, vector<8x8xf32>
    %5 = vector.extract_strided_slice %4 {offsets = [0, 0], sizes = [8, 1], strides = [1, 1]} : vector<8x8xf32> to vector<8x1xf32>
    %6 = vector.extract_strided_slice %4 {offsets = [0, 1], sizes = [8, 1], strides = [1, 1]} : vector<8x8xf32> to vector<8x1xf32>
    %7 = vector.extract_strided_slice %4 {offsets = [0, 2], sizes = [8, 1], strides = [1, 1]} : vector<8x8xf32> to vector<8x1xf32>
    %8 = vector.extract_strided_slice %4 {offsets = [0, 3], sizes = [8, 1], strides = [1, 1]} : vector<8x8xf32> to vector<8x1xf32>
    %9 = vector.extract_strided_slice %4 {offsets = [0, 4], sizes = [8, 1], strides = [1, 1]} : vector<8x8xf32> to vector<8x1xf32>
    %10 = vector.extract_strided_slice %4 {offsets = [0, 5], sizes = [8, 1], strides = [1, 1]} : vector<8x8xf32> to vector<8x1xf32>
    %11 = vector.extract_strided_slice %4 {offsets = [0, 6], sizes = [8, 1], strides = [1, 1]} : vector<8x8xf32> to vector<8x1xf32>
    %12 = vector.extract_strided_slice %4 {offsets = [0, 7], sizes = [8, 1], strides = [1, 1]} : vector<8x8xf32> to vector<8x1xf32>
    %c0_7 = arith.constant 0 : index
    %c0_8 = arith.constant 0 : index
    %13 = vector.load %arg4[%c0_7, %c0_8] : memref<8x4xf32, #tpu.memory_space<vmem>>, vector<8x4xf32>
    %cst = arith.constant dense<0.000000e+00> : vector<8x256xf32>
    %14 = tpu.matmul %13, %1, %cst {dimension_numbers = #tpu.dot_dimension_numbers<[1], [0], [0], [1], [0, 0, 1, 1], [], []>} : vector<8x4xf32>, vector<4x256xf32>, vector<8x256xf32> -> vector<8x256xf32>
    %15 = vector.broadcast %5 : vector<8x1xf32> to vector<8x256xf32>
    %16 = arith.addf %14, %15 : vector<8x256xf32>
    %c0_9 = arith.constant 0 : index
    %c0_10 = arith.constant 0 : index
    %17 = vector.load %arg5[%c0_9, %c0_10] : memref<8x8xf32, #tpu.memory_space<vmem>>, vector<8x8xf32>
    %cst_11 = arith.constant dense<0.000000e+00> : vector<8x256xf32>
    %18 = tpu.matmul %17, %3, %cst_11 {dimension_numbers = #tpu.dot_dimension_numbers<[1], [0], [0], [1], [0, 0, 1, 1], [], []>} : vector<8x8xf32>, vector<8x256xf32>, vector<8x256xf32> -> vector<8x256xf32>
    %19 = vector.broadcast %6 : vector<8x1xf32> to vector<8x256xf32>
    %20 = arith.addf %18, %19 : vector<8x256xf32>
    %c0_12 = arith.constant 0 : index
    %c0_13 = arith.constant 0 : index
    %21 = vector.load %arg7[%c0_12, %c0_13] : memref<8x8xf32, #tpu.memory_space<vmem>>, vector<8x8xf32>
    %c0_14 = arith.constant 0 : index
    %c0_15 = arith.constant 0 : index
    %22 = vector.load %arg6[%c0_14, %c0_15] : memref<8x8xf32, #tpu.memory_space<vmem>>, vector<8x8xf32>
    %cst_16 = arith.constant dense<0.000000e+00> : vector<256xf32>
    %23 = vector.multi_reduction <add>, %16, %cst_16 [0] : vector<8x256xf32> to vector<256xf32>
    %24 = vector.shape_cast %23 : vector<256xf32> to vector<1x256xf32>
    %cst_17 = arith.constant 8.000000e+00 : f32
    %25 = vector.broadcast %cst_17 : f32 to vector<1x256xf32>
    %26 = arith.divf %24, %25 : vector<1x256xf32>
    %27 = vector.broadcast %26 : vector<1x256xf32> to vector<8x256xf32>
    %28 = arith.subf %16, %27 : vector<8x256xf32>
    %29 = vector.broadcast %26 : vector<1x256xf32> to vector<8x256xf32>
    %30 = arith.subf %16, %29 : vector<8x256xf32>
    %31 = arith.mulf %28, %30 : vector<8x256xf32>
    %cst_18 = arith.constant dense<0.000000e+00> : vector<256xf32>
    %32 = vector.multi_reduction <add>, %31, %cst_18 [0] : vector<8x256xf32> to vector<256xf32>
    %33 = vector.shape_cast %32 : vector<256xf32> to vector<1x256xf32>
    %cst_19 = arith.constant 8.000000e+00 : f32
    %34 = vector.broadcast %cst_19 : f32 to vector<1x256xf32>
    %35 = arith.divf %33, %34 : vector<1x256xf32>
    %36 = vector.broadcast %26 : vector<1x256xf32> to vector<8x256xf32>
    %37 = arith.subf %16, %36 : vector<8x256xf32>
    %cst_20 = arith.constant 9.99999974E-6 : f32
    %38 = vector.broadcast %cst_20 : f32 to vector<1x256xf32>
    %39 = arith.addf %35, %38 : vector<1x256xf32>
    %40 = math.rsqrt %39 : vector<1x256xf32>
    %41 = vector.broadcast %40 : vector<1x256xf32> to vector<8x256xf32>
    %42 = arith.mulf %37, %41 : vector<8x256xf32>
    %cst_21 = arith.constant dense<0.000000e+00> : vector<8x256xf32>
    %43 = tpu.matmul %22, %42, %cst_21 {dimension_numbers = #tpu.dot_dimension_numbers<[1], [0], [0], [1], [0, 0, 1, 1], [], []>} : vector<8x8xf32>, vector<8x256xf32>, vector<8x256xf32> -> vector<8x256xf32>
    %44 = vector.broadcast %7 : vector<8x1xf32> to vector<8x256xf32>
    %45 = arith.addf %43, %44 : vector<8x256xf32>
    %46 = arith.mulf %45, %45 : vector<8x256xf32>
    %47 = arith.mulf %45, %46 : vector<8x256xf32>
    %cst_22 = arith.constant 4.471500e-02 : f32
    %48 = vector.broadcast %cst_22 : f32 to vector<8x256xf32>
    %49 = arith.mulf %48, %47 : vector<8x256xf32>
    %50 = arith.addf %45, %49 : vector<8x256xf32>
    %cst_23 = arith.constant 0.797884583 : f32
    %51 = vector.broadcast %cst_23 : f32 to vector<8x256xf32>
    %52 = arith.mulf %51, %50 : vector<8x256xf32>
    %53 = math.tanh %52 : vector<8x256xf32>
    %cst_24 = arith.constant 1.000000e+00 : f32
    %54 = vector.broadcast %cst_24 : f32 to vector<8x256xf32>
    %55 = arith.addf %54, %53 : vector<8x256xf32>
    %cst_25 = arith.constant 5.000000e-01 : f32
    %56 = vector.broadcast %cst_25 : f32 to vector<8x256xf32>
    %57 = arith.mulf %56, %55 : vector<8x256xf32>
    %58 = arith.mulf %45, %57 : vector<8x256xf32>
    %cst_26 = arith.constant dense<0.000000e+00> : vector<8x256xf32>
    %59 = tpu.matmul %21, %58, %cst_26 {dimension_numbers = #tpu.dot_dimension_numbers<[1], [0], [0], [1], [0, 0, 1, 1], [], []>} : vector<8x8xf32>, vector<8x256xf32>, vector<8x256xf32> -> vector<8x256xf32>
    %60 = vector.broadcast %8 : vector<8x1xf32> to vector<8x256xf32>
    %61 = arith.addf %59, %60 : vector<8x256xf32>
    %c0_27 = arith.constant 0 : index
    %c0_28 = arith.constant 0 : index
    %62 = vector.load %arg9[%c0_27, %c0_28] : memref<8x8xf32, #tpu.memory_space<vmem>>, vector<8x8xf32>
    %c0_29 = arith.constant 0 : index
    %c0_30 = arith.constant 0 : index
    %63 = vector.load %arg8[%c0_29, %c0_30] : memref<8x8xf32, #tpu.memory_space<vmem>>, vector<8x8xf32>
    %cst_31 = arith.constant dense<0.000000e+00> : vector<256xf32>
    %64 = vector.multi_reduction <add>, %20, %cst_31 [0] : vector<8x256xf32> to vector<256xf32>
    %65 = vector.shape_cast %64 : vector<256xf32> to vector<1x256xf32>
    %cst_32 = arith.constant 8.000000e+00 : f32
    %66 = vector.broadcast %cst_32 : f32 to vector<1x256xf32>
    %67 = arith.divf %65, %66 : vector<1x256xf32>
    %68 = vector.broadcast %67 : vector<1x256xf32> to vector<8x256xf32>
    %69 = arith.subf %20, %68 : vector<8x256xf32>
    %70 = vector.broadcast %67 : vector<1x256xf32> to vector<8x256xf32>
    %71 = arith.subf %20, %70 : vector<8x256xf32>
    %72 = arith.mulf %69, %71 : vector<8x256xf32>
    %cst_33 = arith.constant dense<0.000000e+00> : vector<256xf32>
    %73 = vector.multi_reduction <add>, %72, %cst_33 [0] : vector<8x256xf32> to vector<256xf32>
    %74 = vector.shape_cast %73 : vector<256xf32> to vector<1x256xf32>
    %cst_34 = arith.constant 8.000000e+00 : f32
    %75 = vector.broadcast %cst_34 : f32 to vector<1x256xf32>
    %76 = arith.divf %74, %75 : vector<1x256xf32>
    %77 = vector.broadcast %67 : vector<1x256xf32> to vector<8x256xf32>
    %78 = arith.subf %20, %77 : vector<8x256xf32>
    %cst_35 = arith.constant 9.99999974E-6 : f32
    %79 = vector.broadcast %cst_35 : f32 to vector<1x256xf32>
    %80 = arith.addf %76, %79 : vector<1x256xf32>
    %81 = math.rsqrt %80 : vector<1x256xf32>
    %82 = vector.broadcast %81 : vector<1x256xf32> to vector<8x256xf32>
    %83 = arith.mulf %78, %82 : vector<8x256xf32>
    %cst_36 = arith.constant dense<0.000000e+00> : vector<8x256xf32>
    %84 = tpu.matmul %63, %83, %cst_36 {dimension_numbers = #tpu.dot_dimension_numbers<[1], [0], [0], [1], [0, 0, 1, 1], [], []>} : vector<8x8xf32>, vector<8x256xf32>, vector<8x256xf32> -> vector<8x256xf32>
    %85 = vector.broadcast %9 : vector<8x1xf32> to vector<8x256xf32>
    %86 = arith.addf %84, %85 : vector<8x256xf32>
    %87 = arith.mulf %86, %86 : vector<8x256xf32>
    %88 = arith.mulf %86, %87 : vector<8x256xf32>
    %cst_37 = arith.constant 4.471500e-02 : f32
    %89 = vector.broadcast %cst_37 : f32 to vector<8x256xf32>
    %90 = arith.mulf %89, %88 : vector<8x256xf32>
    %91 = arith.addf %86, %90 : vector<8x256xf32>
    %cst_38 = arith.constant 0.797884583 : f32
    %92 = vector.broadcast %cst_38 : f32 to vector<8x256xf32>
    %93 = arith.mulf %92, %91 : vector<8x256xf32>
    %94 = math.tanh %93 : vector<8x256xf32>
    %cst_39 = arith.constant 1.000000e+00 : f32
    %95 = vector.broadcast %cst_39 : f32 to vector<8x256xf32>
    %96 = arith.addf %95, %94 : vector<8x256xf32>
    %cst_40 = arith.constant 5.000000e-01 : f32
    %97 = vector.broadcast %cst_40 : f32 to vector<8x256xf32>
    %98 = arith.mulf %97, %96 : vector<8x256xf32>
    %99 = arith.mulf %86, %98 : vector<8x256xf32>
    %cst_41 = arith.constant dense<0.000000e+00> : vector<8x256xf32>
    %100 = tpu.matmul %62, %99, %cst_41 {dimension_numbers = #tpu.dot_dimension_numbers<[1], [0], [0], [1], [0, 0, 1, 1], [], []>} : vector<8x8xf32>, vector<8x256xf32>, vector<8x256xf32> -> vector<8x256xf32>
    %101 = vector.broadcast %10 : vector<8x1xf32> to vector<8x256xf32>
    %102 = arith.addf %100, %101 : vector<8x256xf32>
    %c0_42 = arith.constant 0 : index
    %c0_43 = arith.constant 0 : index
    %103 = vector.load %arg10[%c0_42, %c0_43] : memref<8x8xf32, #tpu.memory_space<vmem>>, vector<8x8xf32>
    %104 = arith.mulf %20, %61 : vector<8x256xf32>
    %cst_44 = arith.constant dense<0.000000e+00> : vector<8x256xf32>
    %105 = tpu.matmul %103, %104, %cst_44 {dimension_numbers = #tpu.dot_dimension_numbers<[1], [0], [0], [1], [0, 0, 1, 1], [], []>} : vector<8x8xf32>, vector<8x256xf32>, vector<8x256xf32> -> vector<8x256xf32>
    %106 = vector.broadcast %11 : vector<8x1xf32> to vector<8x256xf32>
    %107 = arith.addf %105, %106 : vector<8x256xf32>
    %108 = arith.addf %107, %20 : vector<8x256xf32>
    %c0_45 = arith.constant 0 : index
    %c0_46 = arith.constant 0 : index
    %109 = vector.load %arg11[%c0_45, %c0_46] : memref<8x8xf32, #tpu.memory_space<vmem>>, vector<8x8xf32>
    %110 = arith.mulf %16, %102 : vector<8x256xf32>
    %cst_47 = arith.constant dense<0.000000e+00> : vector<8x256xf32>
    %111 = tpu.matmul %109, %110, %cst_47 {dimension_numbers = #tpu.dot_dimension_numbers<[1], [0], [0], [1], [0, 0, 1, 1], [], []>} : vector<8x8xf32>, vector<8x256xf32>, vector<8x256xf32> -> vector<8x256xf32>
    %112 = vector.broadcast %12 : vector<8x1xf32> to vector<8x256xf32>
    %113 = arith.addf %111, %112 : vector<8x256xf32>
    %114 = arith.addf %113, %108 : vector<8x256xf32>
    %115 = arith.addf %114, %16 : vector<8x256xf32>
    %c0_48 = arith.constant 0 : index
    %c0_49 = arith.constant 0 : index
    %c0_50 = arith.constant 0 : index
    %116 = vector.load %arg13[%c0_48, %c0_49, %c0_50] : memref<1x8x256xf32, #tpu.memory_space<vmem>>, vector<1x8x256xf32>
    %117 = vector.shape_cast %116 : vector<1x8x256xf32> to vector<8x256xf32>
    %118 = vector.shape_cast %115 : vector<8x256xf32> to vector<1x8x256xf32>
    tpu.vector_store %arg13[%c0_48, %c0_49, %c0_50], %118 {strides = array<i32>} : memref<1x8x256xf32, #tpu.memory_space<vmem>>, vector<1x8x256xf32>,
    %c0_51 = arith.constant 0 : index
    %c0_52 = arith.constant 0 : index
    %c0_53 = arith.constant 0 : index
    %119 = vector.load %arg14[%c0_51, %c0_52, %c0_53] : memref<1x8x256xf32, #tpu.memory_space<vmem>>, vector<1x8x256xf32>
    %120 = vector.shape_cast %119 : vector<1x8x256xf32> to vector<8x256xf32>
    %121 = vector.shape_cast %108 : vector<8x256xf32> to vector<1x8x256xf32>
    tpu.vector_store %arg14[%c0_51, %c0_52, %c0_53], %121 {strides = array<i32>} : memref<1x8x256xf32, #tpu.memory_space<vmem>>, vector<1x8x256xf32>,
    return
  }
  func.func @transform_0(%arg0: i32, %arg1: i32) -> (i32, i32, i32) {
    %c0_i32 = arith.constant 0 : i32
    %c0_i32_0 = arith.constant 0 : i32
    return %arg0, %c0_i32, %arg1 : i32, i32, i32
  }
  func.func @transform_1(%arg0: i32, %arg1: i32) -> (i32, i32, i32) {
    %c0_i32 = arith.constant 0 : i32
    %c0_i32_0 = arith.constant 0 : i32
    return %arg0, %c0_i32, %arg1 : i32, i32, i32
  }
  func.func @transform_2(%arg0: i32, %arg1: i32) -> (i32, i32) {
    %c0_i32 = arith.constant 0 : i32
    %c0_i32_0 = arith.constant 0 : i32
    %c0_i32_1 = arith.constant 0 : i32
    return %c0_i32, %c0_i32_0 : i32, i32
  }
  func.func @transform_3(%arg0: i32, %arg1: i32) -> (i32, i32) {
    %c0_i32 = arith.constant 0 : i32
    %c0_i32_0 = arith.constant 0 : i32
    %c0_i32_1 = arith.constant 0 : i32
    return %c0_i32, %c0_i32_0 : i32, i32
  }
  func.func @transform_4(%arg0: i32, %arg1: i32) -> (i32, i32) {
    %c0_i32 = arith.constant 0 : i32
    %c0_i32_0 = arith.constant 0 : i32
    %c0_i32_1 = arith.constant 0 : i32
    return %c0_i32, %c0_i32_0 : i32, i32
  }
  func.func @transform_5(%arg0: i32, %arg1: i32) -> (i32, i32) {
    %c0_i32 = arith.constant 0 : i32
    %c0_i32_0 = arith.constant 0 : i32
    %c0_i32_1 = arith.constant 0 : i32
    return %c0_i32, %c0_i32_0 : i32, i32
  }
  func.func @transform_6(%arg0: i32, %arg1: i32) -> (i32, i32) {
    %c0_i32 = arith.constant 0 : i32
    %c0_i32_0 = arith.constant 0 : i32
    %c0_i32_1 = arith.constant 0 : i32
    return %c0_i32, %c0_i32_0 : i32, i32
  }
  func.func @transform_7(%arg0: i32, %arg1: i32) -> (i32, i32) {
    %c0_i32 = arith.constant 0 : i32
    %c0_i32_0 = arith.constant 0 : i32
    %c0_i32_1 = arith.constant 0 : i32
    return %c0_i32, %c0_i32_0 : i32, i32
  }
  func.func @transform_8(%arg0: i32, %arg1: i32) -> (i32, i32) {
    %c0_i32 = arith.constant 0 : i32
    %c0_i32_0 = arith.constant 0 : i32
    %c0_i32_1 = arith.constant 0 : i32
    return %c0_i32, %c0_i32_0 : i32, i32
  }
  func.func @transform_9(%arg0: i32, %arg1: i32) -> (i32, i32) {
    %c0_i32 = arith.constant 0 : i32
    %c0_i32_0 = arith.constant 0 : i32
    %c0_i32_1 = arith.constant 0 : i32
    return %c0_i32, %c0_i32_0 : i32, i32
  }
  func.func @transform_10(%arg0: i32, %arg1: i32) -> (i32, i32) {
    %c0_i32 = arith.constant 0 : i32
    %c0_i32_0 = arith.constant 0 : i32
    %c0_i32_1 = arith.constant 0 : i32
    return %c0_i32, %c0_i32_0 : i32, i32
  }
  func.func @transform_11(%arg0: i32, %arg1: i32) -> (i32, i32, i32) {
    %c0_i32 = arith.constant 0 : i32
    %c0_i32_0 = arith.constant 0 : i32
    return %arg0, %c0_i32, %arg1 : i32, i32, i32
  }
  func.func @transform_12(%arg0: i32, %arg1: i32) -> (i32, i32, i32) {
    %c0_i32 = arith.constant 0 : i32
    %c0_i32_0 = arith.constant 0 : i32
    return %arg0, %c0_i32, %arg1 : i32, i32, i32
  }
}

</mosaic_0001>

<bundles_post_ra>
// kernel: cgb_forward.1
= control target key start
LH: loop header
LB: loop body
LE: loop exit
PB: predicated region body
PF: predicated region fallthrough
CT: control target
= control target key end

     0   :  { %s1432_s21 = smov 0   ;;  %s1434_s22 = smov 0   ;;  %s1587_s0 = inlined_call_operand.vmem [shape: f32[2,4,256], index: 0, kind: input, shape index: {}]   ;;  %s1588_s1 = inlined_call_operand.vmem [shape: f32[2,8,256], index: 1, kind: input, shape index: {}]   ;;  %s1589_s2 = inlined_call_operand.vmem [shape: f32[8,4], index: 2, kind: input, shape index: {}]   ;;  %s1590_s3 = inlined_call_operand.vmem [shape: f32[8,8], index: 3, kind: input, shape index: {}]   ;;  %s1591_s4 = inlined_call_operand.vmem [shape: f32[8,8], index: 4, kind: input, shape index: {}]   ;;  %s1592_s5 = inlined_call_operand.vmem [shape: f32[8,8], index: 5, kind: input, shape index: {}]   ;;  %s1593_s6 = inlined_call_operand.vmem [shape: f32[8,8], index: 6, kind: input, shape index: {}]   ;;  %s1594_s7 = inlined_call_operand.vmem [shape: f32[8,8], index: 7, kind: input, shape index: {}]   ;;  %s1595_s8 = inlined_call_operand.vmem [shape: f32[8,8], index: 8, kind: input, shape index: {}]   ;;  %s1596_s9 = inlined_call_operand.vmem [shape: f32[8,8], index: 9, kind: input, shape index: {}]   ;;  %s1597_s10 = inlined_call_operand.vmem [shape: f32[8,8], index: 10, kind: input, shape index: {}]   ;;  %s1598_s11 = inlined_call_operand.vmem [shape: f32[2,8,256], index: 11, kind: output, shape index: {0}]   ;;  %s1599_s12 = inlined_call_operand.vmem [shape: f32[2,8,256], index: 12, kind: output, shape index: {1}]  }
   0x1   :  { %s1436_s23 = smov 0  }
   0x2 LB: > { %s35_s24 = sadd.s32 1, %s1352_s22  ;;  %p1241_p0 = scmp.ge.s32.totalorder %s1356_s23, 1  ;;  %s1356_s23 = sphi %s1436_s23, %s23_s23   ;;  %s1352_s22 = sphi %s1434_s22, %s1605_s22   ;;  %s1348_s21 = sphi %s1432_s21, %s1604_s21  }
   0x3   : > { %p37_p1 = scmp.ge.s32.totalorder %s35_s24, 2  ;;  %p405_p2 = scmp.lt.s32.totalorder %s1356_s23, 3 }
   0x5   : > { %s1607_s24 = smov (%p37_p1, %s35_s24), 0  ;;  %p406_p3 = pnand %p1241_p0, %p405_p2 }
   0x6   : > { %p474_p4 = scmp.lt.s32.totalorder (!%p406_p3), %s1348_s21, 1 }
   0x7   : > { %409 = sbr.rel (%p406_p3) target bundleno = 646 (0x286), region = 64 }
   0xc   : > { %v1453_v0 = vld [vmem:[%s1597_s10] sm:$0xff]  ;;  %v1358_v1 = vmov 0   ;;  %s1609_s21 = smov (!%p474_p4, %s1348_s21), 1  ;;  %vm581_vm0 = vcmask 64512   ;;  %v1359_v6 = vmov 1   ;;  %vm531_vm1 = vcmask 1043456  }
   0xd   : > { %1307 = vset.pattern.permute.xlu0 %v1358_v1  ;;  %s1270_s27 = sshll.u32 %s1609_s21, 3  ;;  %s1456_s28 = sshll.u32 %s1609_s21, 4  ;;  %v576_v2 = vld [vmem:[%s1590_s3] sm:$0xff]  ;;  %vm527_vm2 = vcmask 31744   ;;  %v1360_v10 = vmov 8.0  }
   0xe   : > { %520 = vperm.xlu0 %1307, %v1453_v0   ;;  %s481_s13 = scalar_lea.vmem %s1587_s0, %s1270_s27  ;;  %s491_s16 = scalar_lea.vmem %s1588_s1, %s1456_s28  ;;  %v517_v7 = vld [vmem:[%s1589_s2] sm:$0xff]  ;;  %1316 = vrcp.f32 %v1360_v10 }
   0xf   : > { %v513_v3 = vld [vmem:[%s481_s13] sm:$0xff]  ;;  %v515_v5 = vld [vmem:[%s491_s16 + $0x8] sm:$0xff]  ;;  %s511_s21 = scalar_lea.vmem %s1599_s12, %s1456_s28  ;;  %s501_s27 = scalar_lea.vmem %s1598_s11, %s1456_s28 }
  0x10   : > { %v514_v4 = vld [vmem:[%s491_s16] sm:$0xff]  ;;  %524 = vst [vmem:[#allocation1] ss:$2 sm:$0xff] %v513_v3  ;;  %620 = vmatpush.msra.mxu3 %v515_v5 }
  0x11   : > { %600 = vmatpush.msra.mxu2 %v514_v4  ;;  %1255 = vmatmul.msk.f32.vlgmr.msra.gmra.mxu3 %vm581_vm0, %v576_v2 }
  0x12   : > { %1254 = vmatmul.msk.f32.vlgmr.msra.gmra.mxu2 %vm581_vm0, %v576_v2 }
  0x14   : > { %v1317_v12 = vpop.eup %1316 }
  0x15   : > { %v640_v13 = vmul.f32 8.0, %v1317_v12  ;;  %vm644_vm3 = vweird.f32 %v1317_v12 }
  0x16   : > { %1308 = vset.pattern.permute.xlu0 %v1359_v6 }
  0x17   : > { %578 = vperm.xlu0 %1308, %v1453_v0   ;;  %v525_v8 = vld.sshfl [vmem:[#allocation1] sm:$0xff pattern:$0x75316420]  ;;  %v526_v9 = vld.sshfl [vmem:[#allocation1 + $0x8] sm:$0xff pattern:$0x75316420] }
  0x18   : > { %1250 = vmatpush.msk.msra.mxu0 %vm531_vm1, %v525_v8  ;;  %1252 = vmatpush.msk.msra.mxu1 %vm531_vm1, %v526_v9  ;;  %v641_v17 = vsub.f32 1.0, %v640_v13 }
  0x19   : > { %1251 = vmatmul.msk.f32.vlgmr.msra.gmra.mxu0 %vm527_vm2, %v517_v7  ;;  %1253 = vmatmul.msk.f32.vlgmr.msra.gmra.mxu1 %vm527_vm2, %v517_v7 }
  0x1a   : > { %v642_v26 = vmul.f32 %v1317_v12, %v641_v17 }
  0x1c   : > { %v643_v35 = vadd.f32 %v1317_v12, %v642_v26 }
  0x1e   : > { %v645_v44 = vsel %vm644_vm3, %v1317_v12, %v643_v35 }
  0x80   : > { %v521_v11 = vpop.permute.xlu0 %520 }
  0x89   : > { %v579_v14 = vpop.permute.xlu0 %578 }
  0x94   : > { %v622_v16 = vpop.f32.mrf.mxu3 }
  0x95   : > { %v602_v15 = vpop.f32.mrf.mxu2  ;;  %v1476_v19 = vadd.f32 %v622_v16, %v579_v14 }
  0x96   : > { %v1474_v18 = vadd.f32 %v602_v15, %v579_v14  ;;  %v553_v20 = vpop.f32.mrf.mxu0  ;;  %v573_v21 = vpop.f32.mrf.mxu1 }
  0x97   : > { %v810_v23 = vrot.slane %v1476_v19, 4  ;;  %v1480_v24 = vadd.f32 %v553_v20, %v521_v11  ;;  %v1482_v25 = vadd.f32 %v573_v21, %v521_v11 }
  0x98   : > { %v804_v22 = vrot.slane %v1474_v18, 4 }
  0x99   : > { %v811_v28 = vadd.f32 %v810_v23, %v1476_v19  ;;  %v627_v29 = vrot.slane %v1480_v24, 4  ;;  %v633_v30 = vrot.slane %v1482_v25, 4 }
  0x9a   : > { %v805_v27 = vadd.f32 %v804_v22, %v1474_v18 }
  0x9b   : > { %v812_v32 = vrot.slane %v811_v28, 2  ;;  %v628_v33 = vadd.f32 %v627_v29, %v1480_v24  ;;  %v634_v34 = vadd.f32 %v633_v30, %v1482_v25 }
  0x9c   : > { %v806_v31 = vrot.slane %v805_v27, 2 }
  0x9d   : > { %v813_v37 = vadd.f32 %v812_v32, %v811_v28  ;;  %v629_v38 = vrot.slane %v628_v33, 2  ;;  %v635_v39 = vrot.slane %v634_v34, 2 }
  0x9e   : > { %v807_v36 = vadd.f32 %v806_v31, %v805_v27 }
  0x9f   : > { %v630_v40 = vadd.f32 %v629_v38, %v628_v33  ;;  %v636_v41 = vadd.f32 %v635_v39, %v634_v34  ;;  %v814_v43 = vrot.slane %v813_v37, 1 }
  0xa0   : > { %v808_v42 = vrot.slane %v807_v36, 1 }
  0xa1   : > { %v631_v45 = vrot.slane %v630_v40, 1  ;;  %v637_v46 = vrot.slane %v636_v41, 1  ;;  %v815_v48 = vadd.f32 %v814_v43, %v813_v37 }
  0xa2   : > { %v809_v47 = vadd.f32 %v808_v42, %v807_v36  ;;  %v1361_v36 = vmov 2  }
  0xa3   : > { %v632_v49 = vadd.f32 %v631_v45, %v630_v40  ;;  %v638_v50 = vadd.f32 %v637_v46, %v636_v41  ;;  %v817_v52 = vmul.f32 %v815_v48, %v645_v44  ;;  %1309 = vset.pattern.permute.xlu1 %v1361_v36 }
  0xa4   : > { %v816_v51 = vmul.f32 %v809_v47, %v645_v44  ;;  %691 = vperm.xlu1 %1309, %v1453_v0  }
  0xa5   : > { %v646_v53 = vmul.f32 %v645_v44, %v632_v49  ;;  %v647_v54 = vmul.f32 %v645_v44, %v638_v50  ;;  %v1494_v56 = vsub.f32 %v1476_v19, %v817_v52  ;;  %v1362_v49 = vmov 4  }
  0xa6   : > { %v1491_v55 = vsub.f32 %v1474_v18, %v816_v51 }
  0xa7   : > { %v1497_v57 = vsub.f32 %v1480_v24, %v646_v53  ;;  %v1500_v58 = vsub.f32 %v1482_v25, %v647_v54  ;;  %v821_v60 = vmul.f32 %v1494_v56, %v1494_v56 }
  0xa8   : > { %v820_v59 = vmul.f32 %v1491_v55, %v1491_v55 }
  0xa9   : > { %v650_v61 = vmul.f32 %v1497_v57, %v1497_v57  ;;  %v651_v62 = vmul.f32 %v1500_v58, %v1500_v58  ;;  %v828_v1 = vrot.slane %v821_v60, 4 }
  0xaa   : > { %v822_v63 = vrot.slane %v820_v59, 4 }
  0xab   : > { %v652_v2 = vrot.slane %v650_v61, 4  ;;  %v658_v3 = vrot.slane %v651_v62, 4  ;;  %v829_v5 = vadd.f32 %v828_v1, %v821_v60 }
  0xac   : > { %v823_v4 = vadd.f32 %v822_v63, %v820_v59  ;;  %1310 = vset.pattern.permute.xlu1 %v1362_v49 }
  0xad   : > { %v653_v6 = vadd.f32 %v652_v2, %v650_v61  ;;  %v659_v7 = vadd.f32 %v658_v3, %v651_v62  ;;  %v830_v9 = vrot.slane %v829_v5, 2  ;;  %861 = vperm.xlu1 %1310, %v1453_v0  }
  0xae   : > { %v824_v8 = vrot.slane %v823_v4, 2 }
  0xaf   : > { %v654_v10 = vrot.slane %v653_v6, 2  ;;  %v660_v11 = vrot.slane %v659_v7, 2  ;;  %v831_v13 = vadd.f32 %v830_v9, %v829_v5  ;;  %v626_v9 = vld [vmem:[%s1591_s4] sm:$0xff] }
  0xb0   : > { %v825_v12 = vadd.f32 %v824_v8, %v823_v4 }
  0xb1   : > { %v655_v14 = vadd.f32 %v654_v10, %v653_v6  ;;  %v661_v15 = vadd.f32 %v660_v11, %v659_v7  ;;  %v832_v17 = vrot.slane %v831_v13, 1 }
  0xb2   : > { %v826_v16 = vrot.slane %v825_v12, 1 }
  0xb3   : > { %v656_v20 = vrot.slane %v655_v14, 1  ;;  %v662_v21 = vrot.slane %v661_v15, 1  ;;  %v833_v23 = vadd.f32 %v832_v17, %v831_v13 }
  0xb4   : > { %v827_v22 = vadd.f32 %v826_v16, %v825_v12 }
  0xb5   : > { %v657_v26 = vadd.f32 %v656_v20, %v655_v14  ;;  %v663_v27 = vadd.f32 %v662_v21, %v661_v15  ;;  %v835_v29 = vmul.f32 %v833_v23, %v645_v44  ;;  %v1363_v21 = vmov 5  }
  0xb6   : > { %v834_v28 = vmul.f32 %v827_v22, %v645_v44  ;;  %1311 = vset.pattern.permute.xlu2 %v1363_v21 }
  0xb7   : > { %v664_v30 = vmul.f32 %v657_v26, %v645_v44  ;;  %v665_v31 = vmul.f32 %v663_v27, %v645_v44  ;;  %v837_v33 = vadd.f32 1e-05, %v835_v29  ;;  %926 = vperm.xlu2 %1311, %v1453_v0  }
  0xb8   : > { %v836_v32 = vadd.f32 1e-05, %v834_v28 }
  0xb9   : > { %v666_v34 = vadd.f32 1e-05, %v664_v30  ;;  %v667_v35 = vadd.f32 1e-05, %v665_v31  ;;  %vm854_vm10 = vweird.f32 %v837_v33 }
  0xba   : > { %1318 = vrsqrt.f32 %v836_v32  ;;  %vm844_vm7 = vweird.f32 %v836_v32 }
  0xbb   : > { %1320 = vrsqrt.f32 %v837_v33  ;;  %vm674_vm11 = vweird.f32 %v666_v34  ;;  %vm684_vm14 = vweird.f32 %v667_v35 }
  0xbc   : > { %1322 = vrsqrt.f32 %v666_v34 }
  0xbd   : > { %1324 = vrsqrt.f32 %v667_v35 }
  0xc0   : > { %v1319_v37 = vpop.eup %1318 }
  0xc1   : > { %v1321_v38 = vpop.eup %1320  ;;  %v839_v39 = vmul.f32 %v1319_v37, %v836_v32  ;;  %vm845_vm4 = vweird.f32 %v1319_v37 }
  0xc2   : > { %v1323_v40 = vpop.eup %1322  ;;  %v849_v41 = vmul.f32 %v1321_v38, %v837_v33  ;;  %vm855_vm5 = vweird.f32 %v1321_v38  ;;  %vm1512_vm9 = vmor %vm844_vm7, %vm845_vm4 }
  0xc3   : > { %v1325_v42 = vpop.eup %1324  ;;  %v669_v43 = vmul.f32 %v1323_v40, %v666_v34  ;;  %v840_v44 = vmul.f32 %v1319_v37, %v839_v39  ;;  %vm675_vm6 = vweird.f32 %v1323_v40  ;;  %vm1516_vm12 = vmor %vm854_vm10, %vm855_vm5 }
  0xc4   : > { %v679_v45 = vmul.f32 %v1325_v42, %v667_v35  ;;  %v850_v46 = vmul.f32 %v1321_v38, %v849_v41  ;;  %vm685_vm8 = vweird.f32 %v1325_v42  ;;  %vm676_vm13 = vmor %vm674_vm11, %vm675_vm6 }
  0xc5   : > { %v670_v47 = vmul.f32 %v1323_v40, %v669_v43  ;;  %v841_v48 = vmul.f32 0.5, %v840_v44  ;;  %vm686_vm15 = vmor %vm684_vm14, %vm685_vm8 }
  0xc6   : > { %v680_v50 = vmul.f32 %v1325_v42, %v679_v45  ;;  %v851_v51 = vmul.f32 0.5, %v850_v46 }
  0xc7   : > { %v671_v52 = vmul.f32 0.5, %v670_v47  ;;  %v842_v53 = vsub.f32 1.5, %v841_v48 }
  0xc8   : > { %v681_v54 = vmul.f32 0.5, %v680_v50  ;;  %v852_v59 = vsub.f32 1.5, %v851_v51 }
  0xc9   : > { %v672_v60 = vsub.f32 1.5, %v671_v52  ;;  %v843_v61 = vmul.f32 %v1319_v37, %v842_v53 }
  0xca   : > { %v682_v62 = vsub.f32 1.5, %v681_v54  ;;  %v853_v1 = vmul.f32 %v1321_v38, %v852_v59  ;;  %v625_v54 = vld [vmem:[%s1592_s5] sm:$0xff] }
  0xcb   : > { %v673_v2 = vmul.f32 %v1323_v40, %v672_v60  ;;  %v847_v6 = vsel %vm1512_vm9, %v1319_v37, %v843_v61 }
  0xcc   : > { %v683_v4 = vmul.f32 %v1325_v42, %v682_v62  ;;  %v857_v10 = vsel %vm1516_vm12, %v1321_v38, %v853_v1  ;;  %v858_v12 = vmul.f32 %v847_v6, %v1491_v55  ;;  %v1365_v6 = vmov 6  }
  0xcd   : > { %v677_v5 = vsel %vm676_vm13, %v1323_v40, %v673_v2  ;;  %v859_v13 = vmul.f32 %v857_v10, %v1494_v56  ;;  %v1364_v40 = vmov 3   ;;  %1313 = vset.pattern.permute.xlu1 %v1365_v6 }
  0xce   : > { %v688_v7 = vmul.f32 %v677_v5, %v1497_v57  ;;  %v687_v8 = vsel %vm686_vm15, %v1325_v42, %v683_v4  ;;  %v803_v57 = vld [vmem:[%s1593_s6] sm:$0xff]  ;;  %1312 = vset.pattern.permute.xlu2 %v1364_v40  ;;  %976 = vperm.xlu1 %1313, %v1453_v0  }
  0xcf   : > { %v689_v11 = vmul.f32 %v687_v8, %v1500_v58  ;;  %756 = vperm.xlu2 %1312, %v1453_v0   ;;  %v802_v4 = vld [vmem:[%s1594_s7] sm:$0xff] }
  0xd0   : > { %712 = vmatpush.msrb.mxu0 %v688_v7  ;;  %v1366_v7 = vmov 7  }
  0xd1   : > { %732 = vmatpush.msrb.mxu1 %v689_v11  ;;  %1256 = vmatmul.msk.f32.vlgmr.msrb.gmra.mxu0 %vm581_vm0, %v626_v9 }
  0xd2   : > { %1257 = vmatmul.msk.f32.vlgmr.msrb.gmra.mxu1 %vm581_vm0, %v626_v9  ;;  %882 = vmatpush.msra.mxu0 %v858_v12 }
  0xd3   : > { %902 = vmatpush.msra.mxu1 %v859_v13  ;;  %1315 = vset.pattern.permute.xlu0 %v1366_v7 }
  0xd7   : > { %1314 = vset.pattern.permute.xlu2 %v1366_v7 }
  0xd8   : > { %1028 = vperm.xlu2 %1314, %v1453_v0  }
  0xd9   : > { %1260 = vmatmul.msk.f32.vlgmr.msra.gmra.mxu0 %vm581_vm0, %v803_v57 }
  0xda   : > { %1261 = vmatmul.msk.f32.vlgmr.msra.gmra.mxu1 %vm581_vm0, %v803_v57 }
 0x111   : > { %v927_v8 = vpop.permute.xlu2 %926 }
 0x116   : > { %v692_v58 = vpop.permute.xlu1 %691 }
 0x11f   : > { %v862_v23 = vpop.permute.xlu1 %861 }
 0x129   : > { %v757_v9 = vpop.permute.xlu2 %756 }
 0x140   : > { %v977_v21 = vpop.permute.xlu1 %976 }
 0x14e   : > { %v714_v14 = vpop.f32.mrf.mxu0 }
 0x14f   : > { %v715_v55 = vadd.f32 %v714_v14, %v692_v58  ;;  %v734_v15 = vpop.f32.mrf.mxu1 }
 0x150   : > { %v735_v16 = vadd.f32 %v734_v15, %v692_v58  ;;  %v972_v58 = vld [vmem:[%s1595_s8] sm:$0xff] }
 0x151   : > { %v737_v17 = vmul.f32 %v715_v55, %v715_v55 }
 0x152   : > { %v738_v20 = vmul.f32 %v735_v16, %v735_v16 }
 0x153   : > { %v739_v56 = vmul.f32 %v737_v17, %v715_v55 }
 0x154   : > { %v740_v22 = vmul.f32 %v738_v20, %v735_v16  ;;  %v1024_v20 = vld [vmem:[%s1596_s9] sm:$0xff] }
 0x155   : > { %v741_v26 = vmul.f32 0.044715, %v739_v56 }
 0x156   : > { %v884_v27 = vpop.f32.mrf.mxu0  ;;  %v742_v28 = vmul.f32 0.044715, %v740_v22 }
 0x157   : > { %v885_v29 = vadd.f32 %v884_v27, %v862_v23  ;;  %v904_v30 = vpop.f32.mrf.mxu1  ;;  %v743_v31 = vadd.f32 %v741_v26, %v715_v55 }
 0x158   : > { %v905_v32 = vadd.f32 %v904_v30, %v862_v23  ;;  %v744_v33 = vadd.f32 %v742_v28, %v735_v16  ;;  %v1029_v30 = vpop.permute.xlu2 %1028 }
 0x159   : > { %v907_v34 = vmul.f32 %v885_v29, %v885_v29  ;;  %v745_v35 = vmul.f32 0.7978846, %v743_v31 }
 0x15a   : > { %v908_v36 = vmul.f32 %v905_v32, %v905_v32  ;;  %v746_v37 = vmul.f32 0.7978846, %v744_v33 }
 0x15b   : > { %v909_v38 = vmul.f32 %v907_v34, %v885_v29  ;;  %1326 = vtanh.f32 %v745_v35 }
 0x15c   : > { %v910_v39 = vmul.f32 %v908_v36, %v905_v32  ;;  %1328 = vtanh.f32 %v746_v37 }
 0x15d   : > { %v911_v41 = vmul.f32 0.044715, %v909_v38 }
 0x15e   : > { %v912_v42 = vmul.f32 0.044715, %v910_v39 }
 0x15f   : > { %v913_v43 = vadd.f32 %v911_v41, %v885_v29 }
 0x160   : > { %v914_v44 = vadd.f32 %v912_v42, %v905_v32 }
 0x161   : > { %v1327_v45 = vpop.eup %1326  ;;  %v915_v46 = vmul.f32 0.7978846, %v913_v43 }
 0x162   : > { %v1329_v47 = vpop.eup %1328  ;;  %v916_v48 = vmul.f32 0.7978846, %v914_v44  ;;  %v749_v49 = vadd.f32 1.0, %v1327_v45 }
 0x163   : > { %1330 = vtanh.f32 %v915_v46  ;;  %v750_v50 = vadd.f32 1.0, %v1329_v47 }
 0x164   : > { %1332 = vtanh.f32 %v916_v48  ;;  %v751_v51 = vmul.f32 0.5, %v749_v49 }
 0x165   : > { %v752_v52 = vmul.f32 0.5, %v750_v50 }
 0x166   : > { %v753_v53 = vmul.f32 %v751_v51, %v715_v55 }
 0x167   : > { %v754_v59 = vmul.f32 %v752_v52, %v735_v16 }
 0x168   : > { %777 = vmatpush.msrb.mxu2 %v753_v53 }
 0x169   : > { %v1331_v60 = vpop.eup %1330  ;;  %797 = vmatpush.msrb.mxu3 %v754_v59  ;;  %1258 = vmatmul.msk.f32.vlgmr.msrb.gmra.mxu2 %vm581_vm0, %v625_v54 }
 0x16a   : > { %v1333_v61 = vpop.eup %1332  ;;  %1259 = vmatmul.msk.f32.vlgmr.msrb.gmra.mxu3 %vm581_vm0, %v625_v54  ;;  %v919_v62 = vadd.f32 1.0, %v1331_v60 }
 0x16b   : > { %v920_v63 = vadd.f32 1.0, %v1333_v61 }
 0x16c   : > { %v921_v1 = vmul.f32 0.5, %v919_v62 }
 0x16d   : > { %v922_v2 = vmul.f32 0.5, %v920_v63 }
 0x16e   : > { %v923_v3 = vmul.f32 %v921_v1, %v885_v29 }
 0x16f   : > { %v924_v5 = vmul.f32 %v922_v2, %v905_v32 }
 0x170   : > { %947 = vmatpush.msra.mxu2 %v923_v3 }
 0x171   : > { %967 = vmatpush.msra.mxu3 %v924_v5  ;;  %1262 = vmatmul.msk.f32.vlgmr.msra.gmra.mxu2 %vm581_vm0, %v802_v4 }
 0x172   : > { %1263 = vmatmul.msk.f32.vlgmr.msra.gmra.mxu3 %vm581_vm0, %v802_v4 }
 0x1ec   : > { %v779_v10 = vpop.f32.mrf.mxu2 }
 0x1ed   : > { %v780_v11 = vadd.f32 %v779_v10, %v757_v9  ;;  %v799_v12 = vpop.f32.mrf.mxu3 }
 0x1ee   : > { %v800_v13 = vadd.f32 %v799_v12, %v757_v9 }
 0x1ef   : > { %v973_v57 = vmul.f32 %v780_v11, %v1474_v18 }
 0x1f0   : > { %v974_v14 = vmul.f32 %v800_v13, %v1476_v19 }
 0x1f1   : > { %997 = vmatpush.msrb.mxu0 %v973_v57 }
 0x1f2   : > { %1017 = vmatpush.msrb.mxu1 %v974_v14  ;;  %1264 = vmatmul.msk.f32.vlgmr.msrb.gmra.mxu0 %vm581_vm0, %v972_v58 }
 0x1f3   : > { %1265 = vmatmul.msk.f32.vlgmr.msrb.gmra.mxu1 %vm581_vm0, %v972_v58 }
 0x1f4   : > { %v949_v0 = vpop.f32.mrf.mxu2 }
 0x1f5   : > { %v950_v55 = vadd.f32 %v949_v0, %v927_v8  ;;  %v969_v15 = vpop.f32.mrf.mxu3 }
 0x1f6   : > { %v970_v16 = vadd.f32 %v969_v15, %v927_v8 }
 0x1f7   : > { %v1025_v17 = vmul.f32 %v950_v55, %v1480_v24 }
 0x1f8   : > { %v1026_v56 = vmul.f32 %v970_v16, %v1482_v25 }
 0x1f9   : > { %1049 = vmatpush.msrb.mxu2 %v1025_v17 }
 0x1fa   : > { %1069 = vmatpush.msrb.mxu3 %v1026_v56  ;;  %1266 = vmatmul.msk.f32.vlgmr.msrb.gmra.mxu2 %vm581_vm0, %v1024_v20 }
 0x1fb   : > { %1267 = vmatmul.msk.f32.vlgmr.msrb.gmra.mxu3 %vm581_vm0, %v1024_v20 }
 0x26f   : > { %v999_v22 = vpop.f32.mrf.mxu0 }
 0x270   : > { %v1000_v23 = vadd.f32 %v999_v22, %v977_v21  ;;  %v1019_v26 = vpop.f32.mrf.mxu1 }
 0x271   : > { %v1020_v27 = vadd.f32 %v1019_v26, %v977_v21 }
 0x272   : > { %v1022_v28 = vadd.f32 %v1000_v23, %v1474_v18 }
 0x273   : > { %v1023_v29 = vadd.f32 %v1020_v27, %v1476_v19 }
 0x274   : > { %1080 = vst [vmem:[%s511_s21] sm:$0xff] %v1022_v28 }
 0x275   : > { %1081 = vst [vmem:[%s511_s21 + $0x8] sm:$0xff] %v1023_v29 }
 0x27d   : > { %v1051_v31 = vpop.f32.mrf.mxu2 }
 0x27e   : > { %v1052_v32 = vadd.f32 %v1051_v31, %v1029_v30  ;;  %v1071_v33 = vpop.f32.mrf.mxu3 }
 0x27f   : > { %v1072_v34 = vadd.f32 %v1071_v33, %v1029_v30 }
 0x280   : > { %v1074_v35 = vadd.f32 %v1052_v32, %v1022_v28 }
 0x281   : > { %v1075_v36 = vadd.f32 %v1072_v34, %v1023_v29 }
 0x282   : > { %v1076_v37 = vadd.f32 %v1074_v35, %v1480_v24 }
 0x283   : > { %v1077_v38 = vadd.f32 %v1075_v36, %v1482_v25 }
 0x284   : > { %1078 = vst [vmem:[%s501_s27] sm:$0xff] %v1076_v37 }
 0x285   : > { %1079 = vst [vmem:[%s501_s27 + $0x8] sm:$0xff] %v1077_v38 }
 0x286 PF: > { %s23_s23 = sadd.s32 1, %s1356_s23   ;;  %s1604_s21 = smov %s1352_s22 }
 0x287   : > { %p20_p5 = scmp.ge.s32.totalorder %s23_s23, 4   ;;  %s1605_s22 = smov %s1607_s24 }
 0x289   :  { %22 = sbr.rel (!%p20_p5) target bundleno = 2 (0x2), region = 109 }

</bundles_post_ra>
